<compile_context>
chip_gen: v6e
topology: v6e:2x2x1
jax: 0.10.0
libtpu: 0.0.40
codegen_flags: <defaults>
</compile_context>

<pallas_src>
import jax
import jax.numpy as jnp
from jax.experimental import pallas as pl
from jax.experimental.pallas import tpu as pltpu

HIDDEN = 256
LANE = 128


def _round_up(n, m):
    return ((n + m - 1) // m) * m


def dqn_kernel(x_ref, w1_ref, b1_ref, w2_ref, b2_ref, w3_ref, b3_ref,
               o_ref, h1_ref, h2_ref):
    # Layer 1: bf16 x bf16 -> f32 on the MXU; bias-add + ReLU in f32 on the
    # VPU; activation staged to bf16 VMEM scratch (breaks live ranges between
    # the three matmuls so big batch tiles don't spill the vreg file).
    h1 = jnp.dot(x_ref[...], w1_ref[...], preferred_element_type=jnp.float32)
    h1_ref[...] = jnp.maximum(h1 + b1_ref[...], 0.0).astype(jnp.bfloat16)

    # Layer 2.
    h2 = jnp.dot(h1_ref[...], w2_ref[...], preferred_element_type=jnp.float32)
    h2_ref[...] = jnp.maximum(h2 + b2_ref[...], 0.0).astype(jnp.bfloat16)

    # Layer 3 (no activation), lane-dense (128-wide) unmasked store.
    out = jnp.dot(h2_ref[...], w3_ref[...], preferred_element_type=jnp.float32)
    o_ref[...] = (out + b3_ref[...]).astype(o_ref.dtype)


def _pick_tiling(B):
    """Return (batch_tile, padded_batch); tiles are multiples of 8 (sublane)."""
    if B < 128:
        tb = _round_up(B, 8)            # single tile, grid = 1
        return tb, tb
    if B < 512:
        # Two balanced tiles -> grid = 2, so dimension_semantics=("parallel",)
        # can shard one tile per TensorCore on v7x (2 TCs).  On single-TC
        # chips this costs at most one extra ~0.35us grid step.
        tb = _round_up(B, 16) // 2
        return tb, 2 * tb
    # Large batch: 256-row tiles amortize the per-step pipeline overhead
    # (per-tile compute is tiny) and automatically give >= 2 grid steps.
    tb = 256
    return tb, _round_up(B, tb)


def _build_dqn_call(tb, b_pad, n_obs, n_pad, out_dtype, single_buffer_weights):
    if single_buffer_weights:
        # Constant index_map -> the block never changes across grid steps, so
        # double-buffering these resident weights would only double their VMEM
        # footprint and add a pointless second prologue copy.
        const = lambda s: pl.BlockSpec(s, lambda i: (0, 0),
                                       pipeline_mode=pl.Buffered(1))
    else:
        const = lambda s: pl.BlockSpec(s, lambda i: (0, 0))

    return pl.pallas_call(
        dqn_kernel,
        out_shape=jax.ShapeDtypeStruct((b_pad, n_pad), out_dtype),
        grid=(b_pad // tb,),
        in_specs=[
            pl.BlockSpec((tb, n_obs), lambda i: (i, 0)),
            const((n_obs, HIDDEN)), const((1, HIDDEN)),
            const((HIDDEN, HIDDEN)), const((1, HIDDEN)),
            const((HIDDEN, n_pad)), const((1, n_pad)),
        ],
        out_specs=pl.BlockSpec((tb, n_pad), lambda i: (i, 0)),
        scratch_shapes=[
            pltpu.VMEM((tb, HIDDEN), jnp.bfloat16),   # h1 staging
            pltpu.VMEM((tb, HIDDEN), jnp.bfloat16),   # h2 staging
        ],
        compiler_params=pltpu.CompilerParams(
            dimension_semantics=("parallel",),
        ),
    )


def dqn_forward(x, prepared, n_actions, out_dtype=jnp.float32):
    """x: (B, n_observations) float. prepared: output of prepare_params().

    NOTE (RL-loop amortization): pre-pad the replay batch to a tile multiple
    once outside the training step (and stack policy/target forwards along the
    batch axis) so the per-call jnp.pad and final slice below become no-ops.
    """
    w1, b1, w2, b2, w3, b3 = (
        prepared["w1"], prepared["b1"], prepared["w2"],
        prepared["b2"], prepared["w3"], prepared["b3"],
    )
    B, n_obs = x.shape
    n_pad = w3.shape[1]  # 128-padded output width

    tb, b_pad = _pick_tiling(B)

    x = x.astype(jnp.bfloat16)           # halve x DMA bytes; no in-kernel cast
    if b_pad != B:
        x = jnp.pad(x, ((0, b_pad - B), (0, 0)))

    args = (x, w1, b1, w2, b2, w3, b3)
    try:
        out = _build_dqn_call(tb, b_pad, n_obs, n_pad, out_dtype, True)(*args)
    except Exception:
        # Fallback if this JAX build rejects pipeline_mode=pl.Buffered(1) for
        # the top-level pallas_call pipeline (purely a VMEM-footprint nicety).
        out = _build_dqn_call(tb, b_pad, n_obs, n_pad, out_dtype, False)(*args)

    return out[:B, :n_actions]


def init_params(key, n_observations, n_actions):
    """Deterministic init mimicking nn.Linear's U(-1/sqrt(fan_in), 1/sqrt(fan_in)).

    Weights stored as (in_features, out_features) = PyTorch weight.T (f32).
    """
    ks = jax.random.split(key, 6)

    def linear(kw, kb, fan_in, fan_out):
        bound = 1.0 / jnp.sqrt(float(fan_in))
        w = jax.random.uniform(kw, (fan_in, fan_out), jnp.float32, -bound, bound)
        b = jax.random.uniform(kb, (fan_out,), jnp.float32, -bound, bound)
        return w, b

    w1, b1 = linear(ks[0], ks[1], n_observations, HIDDEN)
    w2, b2 = linear(ks[2], ks[3], HIDDEN, HIDDEN)
    w3, b3 = linear(ks[4], ks[5], HIDDEN, n_actions)
    return {"w1": w1, "b1": b1, "w2": w2, "b2": b2, "w3": w3, "b3": b3}


def prepare_params(params, n_actions):
    """bf16 matmul operands, f32 biases as (1, out), layer-3 padded to 128 lanes."""
    n_pad = _round_up(max(n_actions, LANE), LANE)
    w3 = jnp.pad(params["w3"], ((0, 0), (0, n_pad - n_actions)))
    b3 = jnp.pad(params["b3"], ((0, n_pad - n_actions),))
    return {
        "w1": params["w1"].astype(jnp.bfloat16),
        "b1": params["b1"].reshape(1, -1).astype(jnp.float32),
        "w2": params["w2"].astype(jnp.bfloat16),
        "b2": params["b2"].reshape(1, -1).astype(jnp.float32),
        "w3": w3.astype(jnp.bfloat16),
        "b3": b3.reshape(1, -1).astype(jnp.float32),
    }


def dqn_ref(x, prepared, n_actions):
    """Pure-JAX reference with identical bf16-operand / f32-accumulate numerics."""
    xb = x.astype(jnp.bfloat16)
    h1 = jnp.maximum(
        jnp.dot(xb, prepared["w1"], preferred_element_type=jnp.float32)
        + prepared["b1"], 0.0)
    h2 = jnp.maximum(
        jnp.dot(h1.astype(jnp.bfloat16), prepared["w2"],
                preferred_element_type=jnp.float32) + prepared["b2"], 0.0)
    out = (jnp.dot(h2.astype(jnp.bfloat16), prepared["w3"],
                   preferred_element_type=jnp.float32) + prepared["b3"])
    return out[:, :n_actions]


def dqn_ref_f32(x, params, n_actions):
    """Full-f32 reference == the PyTorch module's math (documents bf16 gap)."""
    h1 = jnp.maximum(x @ params["w1"] + params["b1"], 0.0)
    h2 = jnp.maximum(h1 @ params["w2"] + params["b2"], 0.0)
    return (h2 @ params["w3"] + params["b3"])[:, :n_actions]


if __name__ == "__main__":
    key = jax.random.PRNGKey(0)
    k_params, k_x1, k_x2 = jax.random.split(key, 3)

    n_observations = 32
    n_actions = 8

    params = init_params(k_params, n_observations, n_actions)
    prepared = prepare_params(params, n_actions)

    # Small inference-style batch: single tile, grid = 1.
    x_small = jax.random.normal(k_x1, (8, n_observations), jnp.float32)
    out_small = jax.block_until_ready(dqn_forward(x_small, prepared, n_actions))
    assert out_small.shape == (8, n_actions)
    ref_small = dqn_ref(x_small, prepared, n_actions)
    assert jnp.allclose(out_small, ref_small, atol=1e-2, rtol=1e-2), \
        "mismatch vs bf16 pure-JAX reference (small batch)"

    # Training-style batch: two balanced tiles -> exercises the parallel grid.
    x_big = jax.random.normal(k_x2, (256, n_observations), jnp.float32)
    out_big = jax.block_until_ready(dqn_forward(x_big, prepared, n_actions))
    assert out_big.shape == (256, n_actions)
    ref_big = dqn_ref(x_big, prepared, n_actions)
    assert jnp.allclose(out_big, ref_big, atol=1e-2, rtol=1e-2), \
        "mismatch vs bf16 pure-JAX reference (batched grid)"

    # Loose check vs the full-f32 PyTorch-equivalent math (bf16 operand gap).
    ref_f32 = dqn_ref_f32(x_small, params, n_actions)
    assert jnp.allclose(out_small, ref_f32, atol=5e-2, rtol=5e-2), \
        "mismatch vs f32 reference beyond documented bf16 tolerance"

    print("KERNEL_OK")
</pallas_src>

<mosaic_0001>
module attributes {stable_mosaic.version = 11 : i64} {
  func.func @dqn_kernel(%arg0: i32, %arg1: memref<8x32xbf16, #tpu.memory_space<vmem>>, %arg2: memref<32x256xbf16, #tpu.memory_space<vmem>>, %arg3: memref<1x256xf32, #tpu.memory_space<vmem>>, %arg4: memref<256x256xbf16, #tpu.memory_space<vmem>>, %arg5: memref<1x256xf32, #tpu.memory_space<vmem>>, %arg6: memref<256x128xbf16, #tpu.memory_space<vmem>>, %arg7: memref<1x128xf32, #tpu.memory_space<vmem>>, %arg8: memref<8x128xf32, #tpu.memory_space<vmem>>, %arg9: memref<8x256xbf16, #tpu.memory_space<vmem>>, %arg10: memref<8x256xbf16, #tpu.memory_space<vmem>>) attributes {dimension_semantics = [#tpu.dimension_semantics<parallel>], iteration_bounds = array<i64: 1>, scalar_prefetch = 0 : i64, scratch_operands = 2 : i64, tpu.core_type = #tpu.core_type<tc>, window_params = [{transform_indices = @transform_0, window_bounds = array<i64: 8, 32>}, {pipeline_mode = #tpu.pipeline_mode<synchronous>, transform_indices = @transform_1, window_bounds = array<i64: 32, 256>}, {pipeline_mode = #tpu.pipeline_mode<synchronous>, transform_indices = @transform_2, window_bounds = array<i64: 1, 256>}, {pipeline_mode = #tpu.pipeline_mode<synchronous>, transform_indices = @transform_3, window_bounds = array<i64: 256, 256>}, {pipeline_mode = #tpu.pipeline_mode<synchronous>, transform_indices = @transform_4, window_bounds = array<i64: 1, 256>}, {pipeline_mode = #tpu.pipeline_mode<synchronous>, transform_indices = @transform_5, window_bounds = array<i64: 256, 128>}, {pipeline_mode = #tpu.pipeline_mode<synchronous>, transform_indices = @transform_6, window_bounds = array<i64: 1, 128>}, {transform_indices = @transform_7, window_bounds = array<i64: 8, 128>}]} {
    %c0 = arith.constant 0 : index
    %c0_0 = arith.constant 0 : index
    %0 = vector.load %arg1[%c0, %c0_0] : memref<8x32xbf16, #tpu.memory_space<vmem>>, vector<8x32xbf16>
    %c0_1 = arith.constant 0 : index
    %c0_2 = arith.constant 0 : index
    %1 = vector.load %arg2[%c0_1, %c0_2] : memref<32x256xbf16, #tpu.memory_space<vmem>>, vector<32x256xbf16>
    %cst = arith.constant dense<0.000000e+00> : vector<8x256xf32>
    %2 = tpu.matmul %0, %1, %cst {dimension_numbers = #tpu.dot_dimension_numbers<[1], [0], [0], [1], [0, 0, 1, 1], [], []>} : vector<8x32xbf16>, vector<32x256xbf16>, vector<8x256xf32> -> vector<8x256xf32>
    %c0_3 = arith.constant 0 : index
    %c0_4 = arith.constant 0 : index
    %3 = vector.load %arg3[%c0_3, %c0_4] : memref<1x256xf32, #tpu.memory_space<vmem>>, vector<1x256xf32>
    %4 = vector.broadcast %3 : vector<1x256xf32> to vector<8x256xf32>
    %5 = arith.addf %2, %4 : vector<8x256xf32>
    %cst_5 = arith.constant 0.000000e+00 : f32
    %6 = vector.broadcast %cst_5 : f32 to vector<8x256xf32>
    %7 = arith.maximumf %5, %6 : vector<8x256xf32>
    %8 = arith.truncf %7 : vector<8x256xf32> to vector<8x256xbf16>
    %c0_6 = arith.constant 0 : index
    %c0_7 = arith.constant 0 : index
    %9 = vector.load %arg9[%c0_6, %c0_7] : memref<8x256xbf16, #tpu.memory_space<vmem>>, vector<8x256xbf16>
    tpu.vector_store %arg9[%c0_6, %c0_7], %8 {strides = array<i32>} : memref<8x256xbf16, #tpu.memory_space<vmem>>, vector<8x256xbf16>,
    %c0_8 = arith.constant 0 : index
    %c0_9 = arith.constant 0 : index
    %10 = vector.load %arg9[%c0_8, %c0_9] : memref<8x256xbf16, #tpu.memory_space<vmem>>, vector<8x256xbf16>
    %c0_10 = arith.constant 0 : index
    %c0_11 = arith.constant 0 : index
    %11 = vector.load %arg4[%c0_10, %c0_11] : memref<256x256xbf16, #tpu.memory_space<vmem>>, vector<256x256xbf16>
    %cst_12 = arith.constant dense<0.000000e+00> : vector<8x256xf32>
    %12 = tpu.matmul %10, %11, %cst_12 {dimension_numbers = #tpu.dot_dimension_numbers<[1], [0], [0], [1], [0, 0, 1, 1], [], []>} : vector<8x256xbf16>, vector<256x256xbf16>, vector<8x256xf32> -> vector<8x256xf32>
    %c0_13 = arith.constant 0 : index
    %c0_14 = arith.constant 0 : index
    %13 = vector.load %arg5[%c0_13, %c0_14] : memref<1x256xf32, #tpu.memory_space<vmem>>, vector<1x256xf32>
    %14 = vector.broadcast %13 : vector<1x256xf32> to vector<8x256xf32>
    %15 = arith.addf %12, %14 : vector<8x256xf32>
    %cst_15 = arith.constant 0.000000e+00 : f32
    %16 = vector.broadcast %cst_15 : f32 to vector<8x256xf32>
    %17 = arith.maximumf %15, %16 : vector<8x256xf32>
    %18 = arith.truncf %17 : vector<8x256xf32> to vector<8x256xbf16>
    %c0_16 = arith.constant 0 : index
    %c0_17 = arith.constant 0 : index
    %19 = vector.load %arg10[%c0_16, %c0_17] : memref<8x256xbf16, #tpu.memory_space<vmem>>, vector<8x256xbf16>
    tpu.vector_store %arg10[%c0_16, %c0_17], %18 {strides = array<i32>} : memref<8x256xbf16, #tpu.memory_space<vmem>>, vector<8x256xbf16>,
    %c0_18 = arith.constant 0 : index
    %c0_19 = arith.constant 0 : index
    %20 = vector.load %arg10[%c0_18, %c0_19] : memref<8x256xbf16, #tpu.memory_space<vmem>>, vector<8x256xbf16>
    %c0_20 = arith.constant 0 : index
    %c0_21 = arith.constant 0 : index
    %21 = vector.load %arg6[%c0_20, %c0_21] : memref<256x128xbf16, #tpu.memory_space<vmem>>, vector<256x128xbf16>
    %cst_22 = arith.constant dense<0.000000e+00> : vector<8x128xf32>
    %22 = tpu.matmul %20, %21, %cst_22 {dimension_numbers = #tpu.dot_dimension_numbers<[1], [0], [0], [1], [0, 0, 1, 1], [], []>} : vector<8x256xbf16>, vector<256x128xbf16>, vector<8x128xf32> -> vector<8x128xf32>
    %c0_23 = arith.constant 0 : index
    %c0_24 = arith.constant 0 : index
    %23 = vector.load %arg7[%c0_23, %c0_24] : memref<1x128xf32, #tpu.memory_space<vmem>>, vector<1x128xf32>
    %24 = vector.broadcast %23 : vector<1x128xf32> to vector<8x128xf32>
    %25 = arith.addf %22, %24 : vector<8x128xf32>
    %c0_25 = arith.constant 0 : index
    %c0_26 = arith.constant 0 : index
    %26 = vector.load %arg8[%c0_25, %c0_26] : memref<8x128xf32, #tpu.memory_space<vmem>>, vector<8x128xf32>
    tpu.vector_store %arg8[%c0_25, %c0_26], %25 {strides = array<i32>} : memref<8x128xf32, #tpu.memory_space<vmem>>, vector<8x128xf32>,
    return
  }
  func.func @transform_0(%arg0: i32) -> (i32, i32) {
    %c0_i32 = arith.constant 0 : i32
    %c0_i32_0 = arith.constant 0 : i32
    return %arg0, %c0_i32 : i32, i32
  }
  func.func @transform_1(%arg0: i32) -> (i32, i32) {
    %c0_i32 = arith.constant 0 : i32
    %c0_i32_0 = arith.constant 0 : i32
    %c0_i32_1 = arith.constant 0 : i32
    return %c0_i32, %c0_i32_0 : i32, i32
  }
  func.func @transform_2(%arg0: i32) -> (i32, i32) {
    %c0_i32 = arith.constant 0 : i32
    %c0_i32_0 = arith.constant 0 : i32
    %c0_i32_1 = arith.constant 0 : i32
    return %c0_i32, %c0_i32_0 : i32, i32
  }
  func.func @transform_3(%arg0: i32) -> (i32, i32) {
    %c0_i32 = arith.constant 0 : i32
    %c0_i32_0 = arith.constant 0 : i32
    %c0_i32_1 = arith.constant 0 : i32
    return %c0_i32, %c0_i32_0 : i32, i32
  }
  func.func @transform_4(%arg0: i32) -> (i32, i32) {
    %c0_i32 = arith.constant 0 : i32
    %c0_i32_0 = arith.constant 0 : i32
    %c0_i32_1 = arith.constant 0 : i32
    return %c0_i32, %c0_i32_0 : i32, i32
  }
  func.func @transform_5(%arg0: i32) -> (i32, i32) {
    %c0_i32 = arith.constant 0 : i32
    %c0_i32_0 = arith.constant 0 : i32
    %c0_i32_1 = arith.constant 0 : i32
    return %c0_i32, %c0_i32_0 : i32, i32
  }
  func.func @transform_6(%arg0: i32) -> (i32, i32) {
    %c0_i32 = arith.constant 0 : i32
    %c0_i32_0 = arith.constant 0 : i32
    %c0_i32_1 = arith.constant 0 : i32
    return %c0_i32, %c0_i32_0 : i32, i32
  }
  func.func @transform_7(%arg0: i32) -> (i32, i32) {
    %c0_i32 = arith.constant 0 : i32
    %c0_i32_0 = arith.constant 0 : i32
    return %arg0, %c0_i32 : i32, i32
  }
}

module attributes {stable_mosaic.version = 11 : i64} {
  func.func @dqn_kernel(%arg0: i32, %arg1: memref<8x32xbf16, #tpu.memory_space<vmem>>, %arg2: memref<32x256xbf16, #tpu.memory_space<vmem>>, %arg3: memref<1x256xf32, #tpu.memory_space<vmem>>, %arg4: memref<256x256xbf16, #tpu.memory_space<vmem>>, %arg5: memref<1x256xf32, #tpu.memory_space<vmem>>, %arg6: memref<256x128xbf16, #tpu.memory_space<vmem>>, %arg7: memref<1x128xf32, #tpu.memory_space<vmem>>, %arg8: memref<8x128xf32, #tpu.memory_space<vmem>>, %arg9: memref<8x256xbf16, #tpu.memory_space<vmem>>, %arg10: memref<8x256xbf16, #tpu.memory_space<vmem>>) attributes {dimension_semantics = [#tpu.dimension_semantics<parallel>], iteration_bounds = array<i64: 1>, scalar_prefetch = 0 : i64, scratch_operands = 2 : i64, tpu.core_type = #tpu.core_type<tc>, window_params = [{transform_indices = @transform_0, window_bounds = array<i64: 8, 32>}, {pipeline_mode = #tpu.pipeline_mode<synchronous>, transform_indices = @transform_1, window_bounds = array<i64: 32, 256>}, {pipeline_mode = #tpu.pipeline_mode<synchronous>, transform_indices = @transform_2, window_bounds = array<i64: 1, 256>}, {pipeline_mode = #tpu.pipeline_mode<synchronous>, transform_indices = @transform_3, window_bounds = array<i64: 256, 256>}, {pipeline_mode = #tpu.pipeline_mode<synchronous>, transform_indices = @transform_4, window_bounds = array<i64: 1, 256>}, {pipeline_mode = #tpu.pipeline_mode<synchronous>, transform_indices = @transform_5, window_bounds = array<i64: 256, 128>}, {pipeline_mode = #tpu.pipeline_mode<synchronous>, transform_indices = @transform_6, window_bounds = array<i64: 1, 128>}, {transform_indices = @transform_7, window_bounds = array<i64: 8, 128>}]} {
    %c0 = arith.constant 0 : index
    %c0_0 = arith.constant 0 : index
    %0 = vector.load %arg1[%c0, %c0_0] : memref<8x32xbf16, #tpu.memory_space<vmem>>, vector<8x32xbf16>
    %c0_1 = arith.constant 0 : index
    %c0_2 = arith.constant 0 : index
    %1 = vector.load %arg2[%c0_1, %c0_2] : memref<32x256xbf16, #tpu.memory_space<vmem>>, vector<32x256xbf16>
    %cst = arith.constant dense<0.000000e+00> : vector<8x256xf32>
    %2 = tpu.matmul %0, %1, %cst {dimension_numbers = #tpu.dot_dimension_numbers<[1], [0], [0], [1], [0, 0, 1, 1], [], []>} : vector<8x32xbf16>, vector<32x256xbf16>, vector<8x256xf32> -> vector<8x256xf32>
    %c0_3 = arith.constant 0 : index
    %c0_4 = arith.constant 0 : index
    %3 = vector.load %arg3[%c0_3, %c0_4] : memref<1x256xf32, #tpu.memory_space<vmem>>, vector<1x256xf32>
    %4 = vector.broadcast %3 : vector<1x256xf32> to vector<8x256xf32>
    %5 = arith.addf %2, %4 : vector<8x256xf32>
    %cst_5 = arith.constant 0.000000e+00 : f32
    %6 = vector.broadcast %cst_5 : f32 to vector<8x256xf32>
    %7 = arith.maximumf %5, %6 : vector<8x256xf32>
    %8 = arith.truncf %7 : vector<8x256xf32> to vector<8x256xbf16>
    %c0_6 = arith.constant 0 : index
    %c0_7 = arith.constant 0 : index
    %9 = vector.load %arg9[%c0_6, %c0_7] : memref<8x256xbf16, #tpu.memory_space<vmem>>, vector<8x256xbf16>
    tpu.vector_store %arg9[%c0_6, %c0_7], %8 {strides = array<i32>} : memref<8x256xbf16, #tpu.memory_space<vmem>>, vector<8x256xbf16>,
    %c0_8 = arith.constant 0 : index
    %c0_9 = arith.constant 0 : index
    %10 = vector.load %arg9[%c0_8, %c0_9] : memref<8x256xbf16, #tpu.memory_space<vmem>>, vector<8x256xbf16>
    %c0_10 = arith.constant 0 : index
    %c0_11 = arith.constant 0 : index
    %11 = vector.load %arg4[%c0_10, %c0_11] : memref<256x256xbf16, #tpu.memory_space<vmem>>, vector<256x256xbf16>
    %cst_12 = arith.constant dense<0.000000e+00> : vector<8x256xf32>
    %12 = tpu.matmul %10, %11, %cst_12 {dimension_numbers = #tpu.dot_dimension_numbers<[1], [0], [0], [1], [0, 0, 1, 1], [], []>} : vector<8x256xbf16>, vector<256x256xbf16>, vector<8x256xf32> -> vector<8x256xf32>
    %c0_13 = arith.constant 0 : index
    %c0_14 = arith.constant 0 : index
    %13 = vector.load %arg5[%c0_13, %c0_14] : memref<1x256xf32, #tpu.memory_space<vmem>>, vector<1x256xf32>
    %14 = vector.broadcast %13 : vector<1x256xf32> to vector<8x256xf32>
    %15 = arith.addf %12, %14 : vector<8x256xf32>
    %cst_15 = arith.constant 0.000000e+00 : f32
    %16 = vector.broadcast %cst_15 : f32 to vector<8x256xf32>
    %17 = arith.maximumf %15, %16 : vector<8x256xf32>
    %18 = arith.truncf %17 : vector<8x256xf32> to vector<8x256xbf16>
    %c0_16 = arith.constant 0 : index
    %c0_17 = arith.constant 0 : index
    %19 = vector.load %arg10[%c0_16, %c0_17] : memref<8x256xbf16, #tpu.memory_space<vmem>>, vector<8x256xbf16>
    tpu.vector_store %arg10[%c0_16, %c0_17], %18 {strides = array<i32>} : memref<8x256xbf16, #tpu.memory_space<vmem>>, vector<8x256xbf16>,
    %c0_18 = arith.constant 0 : index
    %c0_19 = arith.constant 0 : index
    %20 = vector.load %arg10[%c0_18, %c0_19] : memref<8x256xbf16, #tpu.memory_space<vmem>>, vector<8x256xbf16>
    %c0_20 = arith.constant 0 : index
    %c0_21 = arith.constant 0 : index
    %21 = vector.load %arg6[%c0_20, %c0_21] : memref<256x128xbf16, #tpu.memory_space<vmem>>, vector<256x128xbf16>
    %cst_22 = arith.constant dense<0.000000e+00> : vector<8x128xf32>
    %22 = tpu.matmul %20, %21, %cst_22 {dimension_numbers = #tpu.dot_dimension_numbers<[1], [0], [0], [1], [0, 0, 1, 1], [], []>} : vector<8x256xbf16>, vector<256x128xbf16>, vector<8x128xf32> -> vector<8x128xf32>
    %c0_23 = arith.constant 0 : index
    %c0_24 = arith.constant 0 : index
    %23 = vector.load %arg7[%c0_23, %c0_24] : memref<1x128xf32, #tpu.memory_space<vmem>>, vector<1x128xf32>
    %24 = vector.broadcast %23 : vector<1x128xf32> to vector<8x128xf32>
    %25 = arith.addf %22, %24 : vector<8x128xf32>
    %c0_25 = arith.constant 0 : index
    %c0_26 = arith.constant 0 : index
    %26 = vector.load %arg8[%c0_25, %c0_26] : memref<8x128xf32, #tpu.memory_space<vmem>>, vector<8x128xf32>
    tpu.vector_store %arg8[%c0_25, %c0_26], %25 {strides = array<i32>} : memref<8x128xf32, #tpu.memory_space<vmem>>, vector<8x128xf32>,
    return
  }
  func.func @transform_0(%arg0: i32) -> (i32, i32) {
    %c0_i32 = arith.constant 0 : i32
    %c0_i32_0 = arith.constant 0 : i32
    return %arg0, %c0_i32 : i32, i32
  }
  func.func @transform_1(%arg0: i32) -> (i32, i32) {
    %c0_i32 = arith.constant 0 : i32
    %c0_i32_0 = arith.constant 0 : i32
    %c0_i32_1 = arith.constant 0 : i32
    return %c0_i32, %c0_i32_0 : i32, i32
  }
  func.func @transform_2(%arg0: i32) -> (i32, i32) {
    %c0_i32 = arith.constant 0 : i32
    %c0_i32_0 = arith.constant 0 : i32
    %c0_i32_1 = arith.constant 0 : i32
    return %c0_i32, %c0_i32_0 : i32, i32
  }
  func.func @transform_3(%arg0: i32) -> (i32, i32) {
    %c0_i32 = arith.constant 0 : i32
    %c0_i32_0 = arith.constant 0 : i32
    %c0_i32_1 = arith.constant 0 : i32
    return %c0_i32, %c0_i32_0 : i32, i32
  }
  func.func @transform_4(%arg0: i32) -> (i32, i32) {
    %c0_i32 = arith.constant 0 : i32
    %c0_i32_0 = arith.constant 0 : i32
    %c0_i32_1 = arith.constant 0 : i32
    return %c0_i32, %c0_i32_0 : i32, i32
  }
  func.func @transform_5(%arg0: i32) -> (i32, i32) {
    %c0_i32 = arith.constant 0 : i32
    %c0_i32_0 = arith.constant 0 : i32
    %c0_i32_1 = arith.constant 0 : i32
    return %c0_i32, %c0_i32_0 : i32, i32
  }
  func.func @transform_6(%arg0: i32) -> (i32, i32) {
    %c0_i32 = arith.constant 0 : i32
    %c0_i32_0 = arith.constant 0 : i32
    %c0_i32_1 = arith.constant 0 : i32
    return %c0_i32, %c0_i32_0 : i32, i32
  }
  func.func @transform_7(%arg0: i32) -> (i32, i32) {
    %c0_i32 = arith.constant 0 : i32
    %c0_i32_0 = arith.constant 0 : i32
    return %arg0, %c0_i32 : i32, i32
  }
}

</mosaic_0001>

<bundles_post_ra>
// kernel: tpu_custom_call.1
= control target key start
LH: loop header
LB: loop body
LE: loop exit
PB: predicated region body
PF: predicated region fallthrough
CT: control target
= control target key end

     0   :  { %12 = vsyncpa [#allocation5], 0  ;;  %s989_s0 = inlined_call_operand.hbm [shape: bf16[8,32], index: 0, kind: input, shape index: {}]   ;;  %s990_s1 = inlined_call_operand.hbm [shape: bf16[32,256], index: 1, kind: input, shape index: {}]   ;;  %s991_s2 = inlined_call_operand.vmem [shape: f32[1,256], index: 2, kind: input, shape index: {}]   ;;  %s992_s3 = inlined_call_operand.hbm [shape: bf16[256,256], index: 3, kind: input, shape index: {}]   ;;  %s993_s4 = inlined_call_operand.vmem [shape: f32[1,256], index: 4, kind: input, shape index: {}]   ;;  %s994_s5 = inlined_call_operand.hbm [shape: bf16[256,128], index: 5, kind: input, shape index: {}]   ;;  %s995_s6 = inlined_call_operand.vmem [shape: f32[1,128], index: 6, kind: input, shape index: {}]   ;;  %s996_s7 = inlined_call_operand.hbm [shape: f32[8,128], index: 7, kind: output, shape index: {}]  }
   0x1   :  { %13 = vsyncpa [#allocation8], 0 }
   0x2   :  { %14 = vsyncpa [#allocation11], 0 }
   0x3   :  { %15 = vsyncpa [#allocation6], 0  ;;  %s915_s24 = smov [#allocation7]  }
   0x4   :  { %s31_s25 = sshll.u32 %s915_s24, 4  ;;  %s32_s25 = int_to_ptr.vmem [resolvable:$true] %s31_s25 }
   0x5   :  { %s815_s26 = scalar_lea.vmem %s32_s25, 512  ;;  %p820_p1 = scmp.lt.s32.totalorder %s32_s25, %s32_s25 }
   0x6   :  { %p816_p0 = scmp.ne.s32.totalorder %s32_s25, %s815_s26  ;;  %p821_p2 = scmp.lt.s32.totalorder %s815_s26, %s815_s26 }
   0x8   :  { %p822_p3 = por %p821_p2, %p820_p1 }
   0xa   :  { %p823_p4 = pnand %p822_p3, %p816_p0 }
   0xc   :  { %826 = shalt.err (!%p823_p4)
}
   0xd   :  { %s916_s27 = smov 128   ;;  %s917_s28 = smov 8  }
   0xe   :  { %37 = dma.hbm_to_vmem [thread:$0]  %s990_s1, 512, %s32_s25, [#allocation8], %s916_s27, %s916_s27, %s917_s28  }
   0xf   :  { %s918_s8 = smov [#allocation4]   ;;  %s919_s10 = smov [#allocation9]  }
  0x10   :  { %s22_s9 = sshll.u32 %s918_s8, 4  ;;  %s45_s11 = sshll.u32 %s919_s10, 4  ;;  %s23_s9 = int_to_ptr.vmem [resolvable:$true] %s22_s9  ;;  %s46_s11 = int_to_ptr.vmem [resolvable:$true] %s45_s11 }
  0x11   :  { %s835_s12 = scalar_lea.vmem %s23_s9, 64  ;;  %p840_p6 = scmp.lt.s32.totalorder %s23_s9, %s23_s9 }
  0x12   :  { %p836_p5 = scmp.ne.s32.totalorder %s23_s9, %s835_s12  ;;  %p841_p7 = scmp.lt.s32.totalorder %s835_s12, %s835_s12 }
  0x14   :  { %p842_p8 = por %p841_p7, %p840_p6 }
  0x16   :  { %p843_p9 = pnand %p842_p8, %p836_p5 }
  0x18   :  { %846 = shalt.err (!%p843_p9)
}
  0x19   :  { %25 = dma.hbm_to_vmem [thread:$0]  %s989_s0, 64, %s23_s9, [#allocation5]  }
  0x1a   :  { %s855_s15 = scalar_lea.vmem %s46_s11, 4096  ;;  %p860_p11 = scmp.lt.s32.totalorder %s46_s11, %s46_s11 }
  0x1b   :  { %p856_p10 = scmp.ne.s32.totalorder %s46_s11, %s855_s15  ;;  %p861_p12 = scmp.lt.s32.totalorder %s855_s15, %s855_s15 }
  0x1d   :  { %p862_p13 = por %p861_p12, %p860_p11 }
  0x1f   :  { %p863_p0 = pnand %p862_p13, %p856_p10 }
  0x21   :  { %866 = shalt.err (!%p863_p0)
}
  0x22   :  { %51 = dma.hbm_to_vmem [thread:$0]  %s992_s3, 4096, %s46_s11, [#allocation8], %s916_s27, %s916_s27, %s917_s28  }
  0x23   :  { %s920_s17 = smov [#allocation10]  }
  0x24   :  { %s59_s18 = sshll.u32 %s920_s17, 4  ;;  %s60_s18 = int_to_ptr.vmem [resolvable:$true] %s59_s18 }
  0x25   :  { %s875_s19 = scalar_lea.vmem %s60_s18, 2048  ;;  %p880_p2 = scmp.lt.s32.totalorder %s60_s18, %s60_s18 }
  0x26   :  { %p876_p1 = scmp.ne.s32.totalorder %s60_s18, %s875_s19  ;;  %p881_p3 = scmp.lt.s32.totalorder %s875_s19, %s875_s19 }
  0x28   :  { %p882_p4 = por %p881_p3, %p880_p2 }
  0x2a   :  { %p883_p5 = pnand %p882_p4, %p876_p1 }
  0x2c   :  { %886 = shalt.err (!%p883_p5)
}
  0x2d   :  { %s921_s0 = smov 64   ;;  %s922_s20 = smov 4  }
  0x2e   :  { %65 = dma.hbm_to_vmem [thread:$0]  %s994_s5, 2048, %s60_s18, [#allocation11], %s921_s0, %s921_s0, %s922_s20  }
  0x2f   :  { %907 = dma.done.wait [#allocation5], 64  }
  0x30   :  { %908 = vsyncadd [#allocation5], 4294967232 }
  0x31   :  { %909 = dma.done.wait [#allocation8], 4608  }
  0x32   :  { %910 = vsyncadd [#allocation8], 4294962688 }
  0x33   :  { %911 = dma.done.wait [#allocation11], 2048  }
  0x34   :  { %912 = vsyncadd [#allocation11], 4294965248  ;;  %v923_v0 = vmov 0   ;;  %v737_v1 = vld [vmem:[#allocation7 + $0x14] ss:$8 sps:$4 sm:$0xff]   ;;  %vm118_vm0 = vcmask 261120   ;;  %v88_v50 = vlaneseq }
  0x35   :  { %154 = vmatprep.mubr.bf16.mxu0 %v923_v0  ;;  %v739_v2 = vld [vmem:[#allocation7 + $0x10] ss:$8 sps:$4 sm:$0xff]   ;;  %134 = vmatprep.subr.bf16.mxu0 %v737_v1  ;;  %v740_v3 = vld [vmem:[#allocation7 + $0x4] ss:$8 sps:$4 sm:$0xff]   ;;  %v742_v4 = vld [vmem:[#allocation7] ss:$8 sps:$4 sm:$0xff]  }
  0x36   :  { %135 = vmatpush1.bf16.msra.mxu0 %v739_v2  ;;  %v743_v5 = vld [vmem:[#allocation9 + $0x74] ss:$8 sps:$4 sm:$0xff]   ;;  %v745_v6 = vld [vmem:[#allocation9 + $0x70] ss:$8 sps:$4 sm:$0xff]   ;;  %v746_v7 = vld [vmem:[#allocation9 + $0x64] ss:$8 sps:$4 sm:$0xff]  }
  0x37   :  { %136 = vmatprep.subr.bf16.mxu0 %v740_v3  ;;  %386 = vmatprep.subr.bf16.mxu1 %v743_v5  ;;  %v81_v8 = vld [vmem:[#allocation4] sm:$0xf]  ;;  %v748_v9 = vld [vmem:[#allocation9 + $0x60] ss:$8 sps:$4 sm:$0xff]   ;;  %v751_v11 = vld [vmem:[#allocation9 + $0x50] ss:$8 sps:$4 sm:$0xff]  }
  0x38   :  { %387 = vmatpush1.bf16.msra.mxu1 %v745_v6  ;;  %v749_v10 = vld [vmem:[#allocation9 + $0x54] ss:$8 sps:$4 sm:$0xff]   ;;  %v752_v12 = vld [vmem:[#allocation9 + $0x44] ss:$8 sps:$4 sm:$0xff]   ;;  %v754_v13 = vld [vmem:[#allocation9 + $0x40] ss:$8 sps:$4 sm:$0xff]  }
  0x39   :  { %388 = vmatprep.subr.bf16.mxu1 %v746_v7  ;;  %v755_v14 = vld [vmem:[#allocation9 + $0x34] ss:$8 sps:$4 sm:$0xff]   ;;  %v757_v15 = vld [vmem:[#allocation9 + $0x30] ss:$8 sps:$4 sm:$0xff]   ;;  %v758_v16 = vld [vmem:[#allocation9 + $0x24] ss:$8 sps:$4 sm:$0xff]  }
  0x3a   :  { %137 = vmatpush1.bf16.msra.mxu0 %v742_v4  ;;  %v760_v17 = vld [vmem:[#allocation9 + $0x20] ss:$8 sps:$4 sm:$0xff]   ;;  %v761_v18 = vld [vmem:[#allocation9 + $0x14] ss:$8 sps:$4 sm:$0xff]   ;;  %v763_v19 = vld [vmem:[#allocation9 + $0x10] ss:$8 sps:$4 sm:$0xff]  }
  0x3b   :  { %v764_v20 = vld [vmem:[#allocation9 + $0x4] ss:$8 sps:$4 sm:$0xff]   ;;  %v766_v21 = vld [vmem:[#allocation9] ss:$8 sps:$4 sm:$0xff]   ;;  %v767_v22 = vld [vmem:[#allocation9 + $0xf4] ss:$8 sps:$4 sm:$0xff]  }
  0x3c   :  { %389 = vmatpush1.bf16.msra.mxu1 %v748_v9  ;;  %v769_v23 = vld [vmem:[#allocation9 + $0xf0] ss:$8 sps:$4 sm:$0xff]   ;;  %v770_v24 = vld [vmem:[#allocation9 + $0xe4] ss:$8 sps:$4 sm:$0xff]   ;;  %v772_v25 = vld [vmem:[#allocation9 + $0xe0] ss:$8 sps:$4 sm:$0xff]  }
  0x3d   :  { %643 = vmatmul.mubr.msk.bf16.vlgmr.msra.gmra.mxu0 %vm118_vm0, %v81_v8  ;;  %390 = vmatprep.subr.bf16.mxu1 %v749_v10  ;;  %v773_v26 = vld [vmem:[#allocation9 + $0xd4] ss:$8 sps:$4 sm:$0xff]   ;;  %v775_v27 = vld [vmem:[#allocation9 + $0xd0] ss:$8 sps:$4 sm:$0xff]   ;;  %v776_v28 = vld [vmem:[#allocation9 + $0xc4] ss:$8 sps:$4 sm:$0xff]  }
  0x3e   :  { %v778_v29 = vld [vmem:[#allocation9 + $0xc0] ss:$8 sps:$4 sm:$0xff]   ;;  %v779_v30 = vld [vmem:[#allocation9 + $0xb4] ss:$8 sps:$4 sm:$0xff]   ;;  %v781_v31 = vld [vmem:[#allocation9 + $0xb0] ss:$8 sps:$4 sm:$0xff]  }
  0x3f   :  { %v782_v32 = vld [vmem:[#allocation9 + $0xa4] ss:$8 sps:$4 sm:$0xff]   ;;  %v784_v33 = vld [vmem:[#allocation9 + $0xa0] ss:$8 sps:$4 sm:$0xff]   ;;  %v785_v34 = vld [vmem:[#allocation9 + $0x94] ss:$8 sps:$4 sm:$0xff]  }
  0x40   :  { %391 = vmatpush1.bf16.msra.mxu1 %v751_v11  ;;  %v787_v35 = vld [vmem:[#allocation9 + $0x90] ss:$8 sps:$4 sm:$0xff]   ;;  %v788_v36 = vld [vmem:[#allocation9 + $0x84] ss:$8 sps:$4 sm:$0xff]   ;;  %v790_v37 = vld [vmem:[#allocation9 + $0x80] ss:$8 sps:$4 sm:$0xff]  }
  0x41   :  { %392 = vmatprep.subr.bf16.mxu1 %v752_v12  ;;  %v791_v38 = vld [vmem:[#allocation10 + $0x78] sm:$0xff]   ;;  %v793_v40 = vld [vmem:[#allocation10 + $0x70] sm:$0xff]   ;;  %v795_v42 = vld [vmem:[#allocation10 + $0x68] sm:$0xff]   ;;  %v89_v51 = vshrl.u32 %v88_v50, 7 }
  0x42   :  { %v792_v39 = vld [vmem:[#allocation10 + $0x38] sm:$0xff]   ;;  %705 = vmatprep.subr.bf16.mxu0 %v791_v38  ;;  %v794_v41 = vld [vmem:[#allocation10 + $0x30] sm:$0xff]   ;;  %v796_v43 = vld [vmem:[#allocation10 + $0x28] sm:$0xff]  }
  0x43   :  { %706 = vmatpush3.bf16.msra.mxu0 %v792_v39  ;;  %v797_v44 = vld [vmem:[#allocation10 + $0x60] sm:$0xff]   ;;  %v799_v46 = vld [vmem:[#allocation10 + $0x58] sm:$0xff]   ;;  %v801_v48 = vld [vmem:[#allocation10 + $0x50] sm:$0xff]   ;;  %v90_v52 = vsub.s32 0, %v89_v51  ;;  %v94_v54 = vsub.s32 1, %v89_v51 }
  0x44   :  { %393 = vmatpush1.bf16.msra.mxu1 %v754_v13  ;;  %707 = vmatprep.subr.bf16.mxu0 %v793_v40  ;;  %v798_v45 = vld [vmem:[#allocation10 + $0x20] sm:$0xff]   ;;  %v800_v47 = vld [vmem:[#allocation10 + $0x18] sm:$0xff]   ;;  %v802_v49 = vld [vmem:[#allocation10 + $0x10] sm:$0xff]  }
  0x45   :  { %394 = vmatprep.subr.bf16.mxu1 %v755_v14  ;;  %v86_v53 = vld [vmem:[%s991_s2] sm:$0x3]  ;;  %v803_v3 = vld [vmem:[#allocation10 + $0x48] sm:$0xff]   ;;  %v805_v5 = vld [vmem:[#allocation10 + $0x40] sm:$0xff]  }
  0x46   :  { %v91_v55 = vrot.slane %v86_v53, %v90_v52  ;;  %v95_v56 = vrot.slane %v86_v53, %v94_v54  ;;  %v804_v4 = vld [vmem:[#allocation10 + $0x8] sm:$0xff]   ;;  %v806_v6 = vld [vmem:[#allocation10] sm:$0xff]   ;;  %v207_v7 = vld [vmem:[%s993_s4] sm:$0x3]  ;;  %s924_s4 = smov [#allocation12]  }
  0x47   :  { %708 = vmatpush3.bf16.msra.mxu0 %v794_v41  ;;  %v212_v8 = vrot.slane %v207_v7, %v90_v52  ;;  %v216_v9 = vrot.slane %v207_v7, %v94_v54  ;;  %s628_s26 = sshll.u32 %s924_s4, 4  ;;  %s629_s26 = int_to_ptr.vmem [resolvable:$true] %s628_s26 }
  0x48   :  { %395 = vmatpush1.bf16.msra.mxu1 %v757_v15  ;;  %709 = vmatprep.subr.bf16.mxu0 %v795_v42  ;;  %s887_s27 = scalar_lea.vmem %s629_s26, 128  ;;  %p892_p7 = scmp.lt.s32.totalorder %s629_s26, %s629_s26 }
  0x49   :  { %396 = vmatprep.subr.bf16.mxu1 %v758_v16  ;;  %p888_p6 = scmp.ne.s32.totalorder %s629_s26, %s887_s27  ;;  %p893_p8 = scmp.lt.s32.totalorder %s887_s27, %s887_s27 }
  0x4b   :  { %710 = vmatpush3.bf16.msra.mxu0 %v796_v43  ;;  %p894_p9 = por %p893_p8, %p892_p7 }
  0x4c   :  { %397 = vmatpush1.bf16.msra.mxu1 %v760_v17  ;;  %711 = vmatprep.subr.bf16.mxu0 %v797_v44 }
  0x4d   :  { %398 = vmatprep.subr.bf16.mxu1 %v761_v18  ;;  %p895_p10 = pnand %p894_p9, %p888_p6 }
  0x4f   :  { %712 = vmatpush3.bf16.msra.mxu0 %v798_v45 }
  0x50   :  { %399 = vmatpush1.bf16.msra.mxu1 %v763_v19  ;;  %713 = vmatprep.subr.bf16.mxu0 %v799_v46 }
  0x51   :  { %400 = vmatprep.subr.bf16.mxu1 %v764_v20 }
  0x53   :  { %714 = vmatpush3.bf16.msra.mxu0 %v800_v47 }
  0x54   :  { %401 = vmatpush1.bf16.msra.mxu1 %v766_v21  ;;  %715 = vmatprep.subr.bf16.mxu0 %v801_v48  ;;  %v680_v21 = vld [vmem:[%s995_s6] ss:$0 sm:$0xff] }
  0x55   :  { %402 = vmatprep.subr.bf16.mxu1 %v767_v22 }
  0x57   :  { %716 = vmatpush3.bf16.msra.mxu0 %v802_v49 }
  0x58   :  { %403 = vmatpush2.bf16.msra.mxu1 %v769_v23  ;;  %717 = vmatprep.subr.bf16.mxu0 %v803_v3 }
  0x59   :  { %404 = vmatprep.subr.bf16.mxu1 %v770_v24 }
  0x5b   :  { %718 = vmatpush3.bf16.msra.mxu0 %v804_v4 }
  0x5c   :  { %405 = vmatpush2.bf16.msra.mxu1 %v772_v25  ;;  %719 = vmatprep.subr.bf16.mxu0 %v805_v5 }
  0x5d   :  { %406 = vmatprep.subr.bf16.mxu1 %v773_v26 }
  0x5f   :  { %720 = vmatpush3.bf16.msra.mxu0 %v806_v6 }
  0x60   :  { %407 = vmatpush2.bf16.msra.mxu1 %v775_v27 }
  0x61   :  { %408 = vmatprep.subr.bf16.mxu1 %v776_v28 }
  0x64   :  { %409 = vmatpush2.bf16.msra.mxu1 %v778_v29 }
  0x65   :  { %410 = vmatprep.subr.bf16.mxu1 %v779_v30 }
  0x68   :  { %411 = vmatpush2.bf16.msra.mxu1 %v781_v31 }
  0x69   :  { %412 = vmatprep.subr.bf16.mxu1 %v782_v32 }
  0x6c   :  { %413 = vmatpush2.bf16.msra.mxu1 %v784_v33 }
  0x6d   :  { %414 = vmatprep.subr.bf16.mxu1 %v785_v34 }
  0x70   :  { %415 = vmatpush2.bf16.msra.mxu1 %v787_v35 }
  0x71   :  { %416 = vmatprep.subr.bf16.mxu1 %v788_v36 }
  0x74   :  { %417 = vmatpush2.bf16.msra.mxu1 %v790_v37 }
  0xfd   :  { %v156_v57 = vpop.f32.mrf.mxu0 }
  0xfe   :  { %v157_v58 = vadd.f32 %v156_v57, %v91_v55 }
  0xff   :  { %v158_v59 = vpop.f32.mrf.mxu0 }
 0x100   :  { %v159_v60 = vadd.f32 %v158_v59, %v95_v56  ;;  %v163_v61 = vmax.f32 %v157_v58, 0.0 }
 0x101   :  { %v160_v62 = vpop.f32.mrf.mxu0 }
 0x102   :  { %v164_v63 = vmax.f32 %v159_v60, 0.0  ;;  %v701_v2 = vpack.c.bf16 %v163_v61, %v163_v61 }
 0x103   :  { %v161_v0 = vpop.f32.mrf.mxu0 }
 0x104   :  { %v702_v1 = vpack.c.bf16 %v164_v63, %v164_v63 }
 0x106   :  { %418 = vmatprep.mubr.bf16.mxu1 %v702_v1 }
 0x107   :  { %419 = vmatmul.mubr.bf16.vlgmr.msra.gmra.mxu1 %v701_v2 }
 0x1c7   :  { %v420_v10 = vpop.f32.mrf.mxu1 }
 0x1c8   :  { %v421_v11 = vadd.f32 %v420_v10, %v212_v8 }
 0x1c9   :  { %v422_v12 = vpop.f32.mrf.mxu1 }
 0x1ca   :  { %v423_v13 = vadd.f32 %v422_v12, %v216_v9  ;;  %v427_v14 = vmax.f32 %v421_v11, 0.0 }
 0x1cb   :  { %v424_v15 = vpop.f32.mrf.mxu1 }
 0x1cc   :  { %v428_v16 = vmax.f32 %v423_v13, 0.0  ;;  %v703_v19 = vpack.c.bf16 %v427_v14, %v427_v14 }
 0x1cd   :  { %v425_v17 = vpop.f32.mrf.mxu1 }
 0x1ce   :  { %v704_v18 = vpack.c.bf16 %v428_v16, %v428_v16 }
 0x1d0   :  { %613 = vmatprep.mubr.bf16.mxu0 %v704_v18 }
 0x1d1   :  { %614 = vmatmul.mubr.bf16.vlgmr.msra.gmra.mxu0 %v703_v19 }
 0x291   :  { %v721_v20 = vpop.f32.mrf.mxu0 }
 0x293   :  { %v722_v22 = vpop.f32.mrf.mxu0 }
 0x294   :  { %v723_v23 = vadd.f32 %v722_v22, %v721_v20 }
 0x295   :  { %v724_v24 = vpop.f32.mrf.mxu0 }
 0x296   :  { %v616_v25 = vadd.f32 %v723_v23, %v680_v21 }
 0x297   :  { %v725_v26 = vpop.f32.mrf.mxu0 }
 0x298   :  { %621 = vst [vmem:[#allocation12] sm:$0xff] %v616_v25 }
 0x299   :  { %898 = shalt.err (!%p895_p10)
}
 0x29a   :  { %631 = dma.vmem_to_hbm [thread:$0]  %s629_s26, 128, %s996_s7, [#allocation6]  }
 0x29b   :  { %913 = dma.done.wait [#allocation6], 128  }
 0x29c   :  { %914 = vsyncadd [#allocation6], 4294967168 }
 0x29d   :  { %635 = vsyncpa [#allocation5], 1 }
 0x29e   :  { %636 = vsyncpa [#allocation8], 1 }
 0x29f   :  { %637 = vsyncpa [#allocation11], 1 }
 0x2a0   :  { %638 = vsyncpa [#allocation6], 1 }

// kernel: tpu_custom_call.1
= control target key start
LH: loop header
LB: loop body
LE: loop exit
PB: predicated region body
PF: predicated region fallthrough
CT: control target
= control target key end

     0   :  { %12 = vsyncpa [#allocation5], 0  ;;  %s989_s0 = inlined_call_operand.hbm [shape: bf16[8,32], index: 0, kind: input, shape index: {}]   ;;  %s990_s1 = inlined_call_operand.hbm [shape: bf16[32,256], index: 1, kind: input, shape index: {}]   ;;  %s991_s2 = inlined_call_operand.vmem [shape: f32[1,256], index: 2, kind: input, shape index: {}]   ;;  %s992_s3 = inlined_call_operand.hbm [shape: bf16[256,256], index: 3, kind: input, shape index: {}]   ;;  %s993_s4 = inlined_call_operand.vmem [shape: f32[1,256], index: 4, kind: input, shape index: {}]   ;;  %s994_s5 = inlined_call_operand.hbm [shape: bf16[256,128], index: 5, kind: input, shape index: {}]   ;;  %s995_s6 = inlined_call_operand.vmem [shape: f32[1,128], index: 6, kind: input, shape index: {}]   ;;  %s996_s7 = inlined_call_operand.hbm [shape: f32[8,128], index: 7, kind: output, shape index: {}]  }
   0x1   :  { %13 = vsyncpa [#allocation8], 0 }
   0x2   :  { %14 = vsyncpa [#allocation11], 0 }
   0x3   :  { %15 = vsyncpa [#allocation6], 0  ;;  %s915_s24 = smov [#allocation7]  }
   0x4   :  { %s31_s25 = sshll.u32 %s915_s24, 4  ;;  %s32_s25 = int_to_ptr.vmem [resolvable:$true] %s31_s25 }
   0x5   :  { %s815_s26 = scalar_lea.vmem %s32_s25, 512  ;;  %p820_p1 = scmp.lt.s32.totalorder %s32_s25, %s32_s25 }
   0x6   :  { %p816_p0 = scmp.ne.s32.totalorder %s32_s25, %s815_s26  ;;  %p821_p2 = scmp.lt.s32.totalorder %s815_s26, %s815_s26 }
   0x8   :  { %p822_p3 = por %p821_p2, %p820_p1 }
   0xa   :  { %p823_p4 = pnand %p822_p3, %p816_p0 }
   0xc   :  { %826 = shalt.err (!%p823_p4)
}
   0xd   :  { %s916_s27 = smov 128   ;;  %s917_s28 = smov 8  }
   0xe   :  { %37 = dma.hbm_to_vmem [thread:$0]  %s990_s1, 512, %s32_s25, [#allocation8], %s916_s27, %s916_s27, %s917_s28  }
   0xf   :  { %s918_s8 = smov [#allocation4]   ;;  %s919_s10 = smov [#allocation9]  }
  0x10   :  { %s22_s9 = sshll.u32 %s918_s8, 4  ;;  %s45_s11 = sshll.u32 %s919_s10, 4  ;;  %s23_s9 = int_to_ptr.vmem [resolvable:$true] %s22_s9  ;;  %s46_s11 = int_to_ptr.vmem [resolvable:$true] %s45_s11 }
  0x11   :  { %s835_s12 = scalar_lea.vmem %s23_s9, 64  ;;  %p840_p6 = scmp.lt.s32.totalorder %s23_s9, %s23_s9 }
  0x12   :  { %p836_p5 = scmp.ne.s32.totalorder %s23_s9, %s835_s12  ;;  %p841_p7 = scmp.lt.s32.totalorder %s835_s12, %s835_s12 }
  0x14   :  { %p842_p8 = por %p841_p7, %p840_p6 }
  0x16   :  { %p843_p9 = pnand %p842_p8, %p836_p5 }
  0x18   :  { %846 = shalt.err (!%p843_p9)
}
  0x19   :  { %25 = dma.hbm_to_vmem [thread:$0]  %s989_s0, 64, %s23_s9, [#allocation5]  }
  0x1a   :  { %s855_s15 = scalar_lea.vmem %s46_s11, 4096  ;;  %p860_p11 = scmp.lt.s32.totalorder %s46_s11, %s46_s11 }
  0x1b   :  { %p856_p10 = scmp.ne.s32.totalorder %s46_s11, %s855_s15  ;;  %p861_p12 = scmp.lt.s32.totalorder %s855_s15, %s855_s15 }
  0x1d   :  { %p862_p13 = por %p861_p12, %p860_p11 }
  0x1f   :  { %p863_p0 = pnand %p862_p13, %p856_p10 }
  0x21   :  { %866 = shalt.err (!%p863_p0)
}
  0x22   :  { %51 = dma.hbm_to_vmem [thread:$0]  %s992_s3, 4096, %s46_s11, [#allocation8], %s916_s27, %s916_s27, %s917_s28  }
  0x23   :  { %s920_s17 = smov [#allocation10]  }
  0x24   :  { %s59_s18 = sshll.u32 %s920_s17, 4  ;;  %s60_s18 = int_to_ptr.vmem [resolvable:$true] %s59_s18 }
  0x25   :  { %s875_s19 = scalar_lea.vmem %s60_s18, 2048  ;;  %p880_p2 = scmp.lt.s32.totalorder %s60_s18, %s60_s18 }
  0x26   :  { %p876_p1 = scmp.ne.s32.totalorder %s60_s18, %s875_s19  ;;  %p881_p3 = scmp.lt.s32.totalorder %s875_s19, %s875_s19 }
  0x28   :  { %p882_p4 = por %p881_p3, %p880_p2 }
  0x2a   :  { %p883_p5 = pnand %p882_p4, %p876_p1 }
  0x2c   :  { %886 = shalt.err (!%p883_p5)
}
  0x2d   :  { %s921_s0 = smov 64   ;;  %s922_s20 = smov 4  }
  0x2e   :  { %65 = dma.hbm_to_vmem [thread:$0]  %s994_s5, 2048, %s60_s18, [#allocation11], %s921_s0, %s921_s0, %s922_s20  }
  0x2f   :  { %907 = dma.done.wait [#allocation5], 64  }
  0x30   :  { %908 = vsyncadd [#allocation5], 4294967232 }
  0x31   :  { %909 = dma.done.wait [#allocation8], 4608  }
  0x32   :  { %910 = vsyncadd [#allocation8], 4294962688 }
  0x33   :  { %911 = dma.done.wait [#allocation11], 2048  }
  0x34   :  { %912 = vsyncadd [#allocation11], 4294965248  ;;  %v923_v0 = vmov 0   ;;  %v737_v1 = vld [vmem:[#allocation7 + $0x14] ss:$8 sps:$4 sm:$0xff]   ;;  %vm118_vm0 = vcmask 261120   ;;  %v88_v50 = vlaneseq }
  0x35   :  { %154 = vmatprep.mubr.bf16.mxu0 %v923_v0  ;;  %v739_v2 = vld [vmem:[#allocation7 + $0x10] ss:$8 sps:$4 sm:$0xff]   ;;  %134 = vmatprep.subr.bf16.mxu0 %v737_v1  ;;  %v740_v3 = vld [vmem:[#allocation7 + $0x4] ss:$8 sps:$4 sm:$0xff]   ;;  %v742_v4 = vld [vmem:[#allocation7] ss:$8 sps:$4 sm:$0xff]  }
  0x36   :  { %135 = vmatpush1.bf16.msra.mxu0 %v739_v2  ;;  %v743_v5 = vld [vmem:[#allocation9 + $0x74] ss:$8 sps:$4 sm:$0xff]   ;;  %v745_v6 = vld [vmem:[#allocation9 + $0x70] ss:$8 sps:$4 sm:$0xff]   ;;  %v746_v7 = vld [vmem:[#allocation9 + $0x64] ss:$8 sps:$4 sm:$0xff]  }
  0x37   :  { %136 = vmatprep.subr.bf16.mxu0 %v740_v3  ;;  %386 = vmatprep.subr.bf16.mxu1 %v743_v5  ;;  %v81_v8 = vld [vmem:[#allocation4] sm:$0xf]  ;;  %v748_v9 = vld [vmem:[#allocation9 + $0x60] ss:$8 sps:$4 sm:$0xff]   ;;  %v751_v11 = vld [vmem:[#allocation9 + $0x50] ss:$8 sps:$4 sm:$0xff]  }
  0x38   :  { %387 = vmatpush1.bf16.msra.mxu1 %v745_v6  ;;  %v749_v10 = vld [vmem:[#allocation9 + $0x54] ss:$8 sps:$4 sm:$0xff]   ;;  %v752_v12 = vld [vmem:[#allocation9 + $0x44] ss:$8 sps:$4 sm:$0xff]   ;;  %v754_v13 = vld [vmem:[#allocation9 + $0x40] ss:$8 sps:$4 sm:$0xff]  }
  0x39   :  { %388 = vmatprep.subr.bf16.mxu1 %v746_v7  ;;  %v755_v14 = vld [vmem:[#allocation9 + $0x34] ss:$8 sps:$4 sm:$0xff]   ;;  %v757_v15 = vld [vmem:[#allocation9 + $0x30] ss:$8 sps:$4 sm:$0xff]   ;;  %v758_v16 = vld [vmem:[#allocation9 + $0x24] ss:$8 sps:$4 sm:$0xff]  }
  0x3a   :  { %137 = vmatpush1.bf16.msra.mxu0 %v742_v4  ;;  %v760_v17 = vld [vmem:[#allocation9 + $0x20] ss:$8 sps:$4 sm:$0xff]   ;;  %v761_v18 = vld [vmem:[#allocation9 + $0x14] ss:$8 sps:$4 sm:$0xff]   ;;  %v763_v19 = vld [vmem:[#allocation9 + $0x10] ss:$8 sps:$4 sm:$0xff]  }
  0x3b   :  { %v764_v20 = vld [vmem:[#allocation9 + $0x4] ss:$8 sps:$4 sm:$0xff]   ;;  %v766_v21 = vld [vmem:[#allocation9] ss:$8 sps:$4 sm:$0xff]   ;;  %v767_v22 = vld [vmem:[#allocation9 + $0xf4] ss:$8 sps:$4 sm:$0xff]  }
  0x3c   :  { %389 = vmatpush1.bf16.msra.mxu1 %v748_v9  ;;  %v769_v23 = vld [vmem:[#allocation9 + $0xf0] ss:$8 sps:$4 sm:$0xff]   ;;  %v770_v24 = vld [vmem:[#allocation9 + $0xe4] ss:$8 sps:$4 sm:$0xff]   ;;  %v772_v25 = vld [vmem:[#allocation9 + $0xe0] ss:$8 sps:$4 sm:$0xff]  }
  0x3d   :  { %643 = vmatmul.mubr.msk.bf16.vlgmr.msra.gmra.mxu0 %vm118_vm0, %v81_v8  ;;  %390 = vmatprep.subr.bf16.mxu1 %v749_v10  ;;  %v773_v26 = vld [vmem:[#allocation9 + $0xd4] ss:$8 sps:$4 sm:$0xff]   ;;  %v775_v27 = vld [vmem:[#allocation9 + $0xd0] ss:$8 sps:$4 sm:$0xff]   ;;  %v776_v28 = vld [vmem:[#allocation9 + $0xc4] ss:$8 sps:$4 sm:$0xff]  }
  0x3e   :  { %v778_v29 = vld [vmem:[#allocation9 + $0xc0] ss:$8 sps:$4 sm:$0xff]   ;;  %v779_v30 = vld [vmem:[#allocation9 + $0xb4] ss:$8 sps:$4 sm:$0xff]   ;;  %v781_v31 = vld [vmem:[#allocation9 + $0xb0] ss:$8 sps:$4 sm:$0xff]  }
  0x3f   :  { %v782_v32 = vld [vmem:[#allocation9 + $0xa4] ss:$8 sps:$4 sm:$0xff]   ;;  %v784_v33 = vld [vmem:[#allocation9 + $0xa0] ss:$8 sps:$4 sm:$0xff]   ;;  %v785_v34 = vld [vmem:[#allocation9 + $0x94] ss:$8 sps:$4 sm:$0xff]  }
  0x40   :  { %391 = vmatpush1.bf16.msra.mxu1 %v751_v11  ;;  %v787_v35 = vld [vmem:[#allocation9 + $0x90] ss:$8 sps:$4 sm:$0xff]   ;;  %v788_v36 = vld [vmem:[#allocation9 + $0x84] ss:$8 sps:$4 sm:$0xff]   ;;  %v790_v37 = vld [vmem:[#allocation9 + $0x80] ss:$8 sps:$4 sm:$0xff]  }
  0x41   :  { %392 = vmatprep.subr.bf16.mxu1 %v752_v12  ;;  %v791_v38 = vld [vmem:[#allocation10 + $0x78] sm:$0xff]   ;;  %v793_v40 = vld [vmem:[#allocation10 + $0x70] sm:$0xff]   ;;  %v795_v42 = vld [vmem:[#allocation10 + $0x68] sm:$0xff]   ;;  %v89_v51 = vshrl.u32 %v88_v50, 7 }
  0x42   :  { %v792_v39 = vld [vmem:[#allocation10 + $0x38] sm:$0xff]   ;;  %705 = vmatprep.subr.bf16.mxu0 %v791_v38  ;;  %v794_v41 = vld [vmem:[#allocation10 + $0x30] sm:$0xff]   ;;  %v796_v43 = vld [vmem:[#allocation10 + $0x28] sm:$0xff]  }
  0x43   :  { %706 = vmatpush3.bf16.msra.mxu0 %v792_v39  ;;  %v797_v44 = vld [vmem:[#allocation10 + $0x60] sm:$0xff]   ;;  %v799_v46 = vld [vmem:[#allocation10 + $0x58] sm:$0xff]   ;;  %v801_v48 = vld [vmem:[#allocation10 + $0x50] sm:$0xff]   ;;  %v90_v52 = vsub.s32 0, %v89_v51  ;;  %v94_v54 = vsub.s32 1, %v89_v51 }
  0x44   :  { %393 = vmatpush1.bf16.msra.mxu1 %v754_v13  ;;  %707 = vmatprep.subr.bf16.mxu0 %v793_v40  ;;  %v798_v45 = vld [vmem:[#allocation10 + $0x20] sm:$0xff]   ;;  %v800_v47 = vld [vmem:[#allocation10 + $0x18] sm:$0xff]   ;;  %v802_v49 = vld [vmem:[#allocation10 + $0x10] sm:$0xff]  }
  0x45   :  { %394 = vmatprep.subr.bf16.mxu1 %v755_v14  ;;  %v86_v53 = vld [vmem:[%s991_s2] sm:$0x3]  ;;  %v803_v3 = vld [vmem:[#allocation10 + $0x48] sm:$0xff]   ;;  %v805_v5 = vld [vmem:[#allocation10 + $0x40] sm:$0xff]  }
  0x46   :  { %v91_v55 = vrot.slane %v86_v53, %v90_v52  ;;  %v95_v56 = vrot.slane %v86_v53, %v94_v54  ;;  %v804_v4 = vld [vmem:[#allocation10 + $0x8] sm:$0xff]   ;;  %v806_v6 = vld [vmem:[#allocation10] sm:$0xff]   ;;  %v207_v7 = vld [vmem:[%s993_s4] sm:$0x3]  ;;  %s924_s4 = smov [#allocation12]  }
  0x47   :  { %708 = vmatpush3.bf16.msra.mxu0 %v794_v41  ;;  %v212_v8 = vrot.slane %v207_v7, %v90_v52  ;;  %v216_v9 = vrot.slane %v207_v7, %v94_v54  ;;  %s628_s26 = sshll.u32 %s924_s4, 4  ;;  %s629_s26 = int_to_ptr.vmem [resolvable:$true] %s628_s26 }
  0x48   :  { %395 = vmatpush1.bf16.msra.mxu1 %v757_v15  ;;  %709 = vmatprep.subr.bf16.mxu0 %v795_v42  ;;  %s887_s27 = scalar_lea.vmem %s629_s26, 128  ;;  %p892_p7 = scmp.lt.s32.totalorder %s629_s26, %s629_s26 }
  0x49   :  { %396 = vmatprep.subr.bf16.mxu1 %v758_v16  ;;  %p888_p6 = scmp.ne.s32.totalorder %s629_s26, %s887_s27  ;;  %p893_p8 = scmp.lt.s32.totalorder %s887_s27, %s887_s27 }
  0x4b   :  { %710 = vmatpush3.bf16.msra.mxu0 %v796_v43  ;;  %p894_p9 = por %p893_p8, %p892_p7 }
  0x4c   :  { %397 = vmatpush1.bf16.msra.mxu1 %v760_v17  ;;  %711 = vmatprep.subr.bf16.mxu0 %v797_v44 }
  0x4d   :  { %398 = vmatprep.subr.bf16.mxu1 %v761_v18  ;;  %p895_p10 = pnand %p894_p9, %p888_p6 }
  0x4f   :  { %712 = vmatpush3.bf16.msra.mxu0 %v798_v45 }
  0x50   :  { %399 = vmatpush1.bf16.msra.mxu1 %v763_v19  ;;  %713 = vmatprep.subr.bf16.mxu0 %v799_v46 }
  0x51   :  { %400 = vmatprep.subr.bf16.mxu1 %v764_v20 }
  0x53   :  { %714 = vmatpush3.bf16.msra.mxu0 %v800_v47 }
  0x54   :  { %401 = vmatpush1.bf16.msra.mxu1 %v766_v21  ;;  %715 = vmatprep.subr.bf16.mxu0 %v801_v48  ;;  %v680_v21 = vld [vmem:[%s995_s6] ss:$0 sm:$0xff] }
  0x55   :  { %402 = vmatprep.subr.bf16.mxu1 %v767_v22 }
  0x57   :  { %716 = vmatpush3.bf16.msra.mxu0 %v802_v49 }
  0x58   :  { %403 = vmatpush2.bf16.msra.mxu1 %v769_v23  ;;  %717 = vmatprep.subr.bf16.mxu0 %v803_v3 }
  0x59   :  { %404 = vmatprep.subr.bf16.mxu1 %v770_v24 }
  0x5b   :  { %718 = vmatpush3.bf16.msra.mxu0 %v804_v4 }
  0x5c   :  { %405 = vmatpush2.bf16.msra.mxu1 %v772_v25  ;;  %719 = vmatprep.subr.bf16.mxu0 %v805_v5 }
  0x5d   :  { %406 = vmatprep.subr.bf16.mxu1 %v773_v26 }
  0x5f   :  { %720 = vmatpush3.bf16.msra.mxu0 %v806_v6 }
  0x60   :  { %407 = vmatpush2.bf16.msra.mxu1 %v775_v27 }
  0x61   :  { %408 = vmatprep.subr.bf16.mxu1 %v776_v28 }
  0x64   :  { %409 = vmatpush2.bf16.msra.mxu1 %v778_v29 }
  0x65   :  { %410 = vmatprep.subr.bf16.mxu1 %v779_v30 }
  0x68   :  { %411 = vmatpush2.bf16.msra.mxu1 %v781_v31 }
  0x69   :  { %412 = vmatprep.subr.bf16.mxu1 %v782_v32 }
  0x6c   :  { %413 = vmatpush2.bf16.msra.mxu1 %v784_v33 }
  0x6d   :  { %414 = vmatprep.subr.bf16.mxu1 %v785_v34 }
  0x70   :  { %415 = vmatpush2.bf16.msra.mxu1 %v787_v35 }
  0x71   :  { %416 = vmatprep.subr.bf16.mxu1 %v788_v36 }
  0x74   :  { %417 = vmatpush2.bf16.msra.mxu1 %v790_v37 }
  0xfd   :  { %v156_v57 = vpop.f32.mrf.mxu0 }
  0xfe   :  { %v157_v58 = vadd.f32 %v156_v57, %v91_v55 }
  0xff   :  { %v158_v59 = vpop.f32.mrf.mxu0 }
 0x100   :  { %v159_v60 = vadd.f32 %v158_v59, %v95_v56  ;;  %v163_v61 = vmax.f32 %v157_v58, 0.0 }
 0x101   :  { %v160_v62 = vpop.f32.mrf.mxu0 }
 0x102   :  { %v164_v63 = vmax.f32 %v159_v60, 0.0  ;;  %v701_v2 = vpack.c.bf16 %v163_v61, %v163_v61 }
 0x103   :  { %v161_v0 = vpop.f32.mrf.mxu0 }
 0x104   :  { %v702_v1 = vpack.c.bf16 %v164_v63, %v164_v63 }
 0x106   :  { %418 = vmatprep.mubr.bf16.mxu1 %v702_v1 }
 0x107   :  { %419 = vmatmul.mubr.bf16.vlgmr.msra.gmra.mxu1 %v701_v2 }
 0x1c7   :  { %v420_v10 = vpop.f32.mrf.mxu1 }
 0x1c8   :  { %v421_v11 = vadd.f32 %v420_v10, %v212_v8 }
 0x1c9   :  { %v422_v12 = vpop.f32.mrf.mxu1 }
 0x1ca   :  { %v423_v13 = vadd.f32 %v422_v12, %v216_v9  ;;  %v427_v14 = vmax.f32 %v421_v11, 0.0 }
 0x1cb   :  { %v424_v15 = vpop.f32.mrf.mxu1 }
 0x1cc   :  { %v428_v16 = vmax.f32 %v423_v13, 0.0  ;;  %v703_v19 = vpack.c.bf16 %v427_v14, %v427_v14 }
 0x1cd   :  { %v425_v17 = vpop.f32.mrf.mxu1 }
 0x1ce   :  { %v704_v18 = vpack.c.bf16 %v428_v16, %v428_v16 }
 0x1d0   :  { %613 = vmatprep.mubr.bf16.mxu0 %v704_v18 }
 0x1d1   :  { %614 = vmatmul.mubr.bf16.vlgmr.msra.gmra.mxu0 %v703_v19 }
 0x291   :  { %v721_v20 = vpop.f32.mrf.mxu0 }
 0x293   :  { %v722_v22 = vpop.f32.mrf.mxu0 }
 0x294   :  { %v723_v23 = vadd.f32 %v722_v22, %v721_v20 }
 0x295   :  { %v724_v24 = vpop.f32.mrf.mxu0 }
 0x296   :  { %v616_v25 = vadd.f32 %v723_v23, %v680_v21 }
 0x297   :  { %v725_v26 = vpop.f32.mrf.mxu0 }
 0x298   :  { %621 = vst [vmem:[#allocation12] sm:$0xff] %v616_v25 }
 0x299   :  { %898 = shalt.err (!%p895_p10)
}
 0x29a   :  { %631 = dma.vmem_to_hbm [thread:$0]  %s629_s26, 128, %s996_s7, [#allocation6]  }
 0x29b   :  { %913 = dma.done.wait [#allocation6], 128  }
 0x29c   :  { %914 = vsyncadd [#allocation6], 4294967168 }
 0x29d   :  { %635 = vsyncpa [#allocation5], 1 }
 0x29e   :  { %636 = vsyncpa [#allocation8], 1 }
 0x29f   :  { %637 = vsyncpa [#allocation11], 1 }
 0x2a0   :  { %638 = vsyncpa [#allocation6], 1 }

</bundles_post_ra>
